<compile_context>
chip_gen: v7x
topology: tpu7x:2x2x1
jax: 0.10.0
libtpu: 0.0.40
codegen_flags: <defaults>
</compile_context>

<pallas_src>
import functools

import jax
import jax.numpy as jnp
from jax.experimental import pallas as pl
from jax.experimental.pallas import tpu as pltpu


# ---------------------------------------------------------------------------
# Kernel
# ---------------------------------------------------------------------------
def _attn_head_kernel(x_ref, w1_ref, b1_ref, w2_ref, wr_ref, br_ref, out_ref,
                      *, batch_tile, seq_len, tanh_dtype):
    TB, S = batch_tile, seq_len

    x = x_ref[...]                                   # [TB*S, D] token rows (f32 or bf16)

    # linear1: bf16 MXU operands, f32 accumulation.  bf16 cast happens here, on the
    # already-resident VMEM tile, so the wrapper never writes a bf16 copy of x to HBM.
    xb = x if x.dtype == jnp.bfloat16 else x.astype(jnp.bfloat16)
    h = jnp.dot(xb, w1_ref[...], preferred_element_type=jnp.float32)      # [rows, H] f32

    # tanh on the single EUP; bf16 on v6e/v7x (faster EUP + half the VMEM for `a`),
    # f32 on v5e (no bf16 EUP -> casts would only add VPU work).
    a = jnp.tanh((h + b1_ref[...]).astype(tanh_dtype))                    # [rows, H]

    # linear2 (out_features=1): VPU multiply + lane reduce over H (no N=1 MXU pass).
    # linear2.bias is intentionally dropped: softmax is shift-invariant, so it cancels exactly.
    score = jnp.sum(a * w2_ref[...], axis=-1)                             # [rows] f32

    # Fused regressor applied per token (before the softmax-weighted sum):
    #   (sum_s w_s x_s) . wr + br == sum_s w_s (x_s . wr) + br
    # computed from original-precision x so the regressor path keeps input fidelity.
    proj = jnp.sum(x * wr_ref[...], axis=-1)                              # [rows] f32

    # Lane-dense softmax over the sequence axis.  Only the two small 1-D vectors are relaid
    # out sublane->lane here (TB*S*4 B each); keepdims was dropped above on purpose.
    # TODO(synk): if a bundle dump ever shows this relayout or the dot->tanh->reduce chain
    # serialized, chunk the M dimension with a short unrolled fori_loop.
    score = score.reshape(TB, S)
    proj = proj.reshape(TB, S)
    m = jnp.max(score, axis=-1, keepdims=True)
    e = jnp.exp(score - m)
    denom = jnp.sum(e, axis=-1, keepdims=True)
    wts = e * pl.reciprocal(denom, approx=True)   # approx recip: weights sum to 1 +- ~1e-3

    out = jnp.sum(wts * proj, axis=-1, keepdims=True) + br_ref[0, 0]      # [TB, 1]
    out_ref[...] = out.astype(out_ref.dtype)


# ---------------------------------------------------------------------------
# Chip-aware sizing helpers
# ---------------------------------------------------------------------------
def _device_kind() -> str:
    try:
        return jax.devices()[0].device_kind.lower()
    except Exception:
        return ""


def _vmem_capacity_bytes() -> int:
    try:
        return int(pltpu.get_tpu_info().vmem_capacity_bytes)
    except Exception:
        return 64 << 20        # conservative fallback (v7x physical per-TC VMEM)


def _estimate_step_vmem_bytes(TB, S, D, H, x_bytes_per_elem, tanh_bf16):
    """Per-grid-step VMEM footprint, including the [rows, H] intermediates."""
    rows = TB * S
    x_tile = 2 * rows * D * x_bytes_per_elem        # double-buffered pipelined x tile
    xb = rows * D * 2                                # in-kernel bf16 copy for the MXU
    h = rows * H * 4                                 # f32 matmul accumulator
    a = rows * H * (2 if tanh_bf16 else 4)           # tanh activation
    vectors = 8 * rows * 4                           # score / proj / exp / weights / slack
    weights = 2 * D * H * 2 + (2 * H + D) * 4 + 64   # resident W1 (bf16, counted x2) + b1/w2/wr
    return x_tile + xb + h + a + vectors + weights


def _pick_batch_tile(B, S, D, H, x_bytes_per_elem, tanh_bf16, vmem_budget):
    """Largest TB dividing B that fits the VMEM budget, keeping NB >= 2 when possible
    (so v7x's two TensorCores both get grid work) and TB*S sublane aligned."""
    best = 1
    for tb in range(B, 0, -1):
        if B % tb:
            continue
        rows = tb * S
        if rows % 8 and rows != B * S:               # (8,128) block constraint on [rows, D]
            continue
        if B >= 2 and B // tb < 2:                   # keep NB >= 2 for megacore sharding
            continue
        if _estimate_step_vmem_bytes(tb, S, D, H, x_bytes_per_elem, tanh_bf16) <= vmem_budget:
            best = tb
            break
    return best


# ---------------------------------------------------------------------------
# Wrapper
# ---------------------------------------------------------------------------
def my_model_attn_head(last_hidden_state, w1t, b1, w2, b2, wr, br, *, batch_tile=None):
    """last_hidden_state: [B,S,D] (f32 or bf16).  Weight layout (pre-transposed where needed):
       w1t: [D,H] = linear1.weight.T, b1: [1,H], w2: [1,H] = linear2.weight, b2: [1,1],
       wr: [1,D] = regressor.weight, br: [1,1].
       b2 is accepted for module parity but unused (softmax shift-invariance)."""
    del b2
    B, S, D = last_hidden_state.shape
    H = w1t.shape[1]

    kind = _device_kind()
    is_v5 = "v5" in kind
    tanh_dtype = jnp.float32 if is_v5 else jnp.bfloat16     # bf16 EUP only on v6e/v7x

    # Scoped-VMEM limit from physical capacity minus headroom:
    #   v5e/v6e (128 MiB physical) -> 96 MiB;  v7x (64 MiB physical) -> 48 MiB.
    cap = _vmem_capacity_bytes()
    vmem_limit = int(max(32 << 20, min(cap - (16 << 20), 96 << 20)))

    x_bytes = 2 if last_hidden_state.dtype == jnp.bfloat16 else 4
    TB = batch_tile if batch_tile is not None else _pick_batch_tile(
        B, S, D, H, x_bytes, tanh_dtype == jnp.bfloat16, vmem_limit)
    assert B % TB == 0, "batch_tile must divide the batch"
    rows = TB * S
    assert rows % 8 == 0 or rows == B * S, "TB*S must be sublane aligned (multiple of 8)"
    NB = B // TB

    # [B,S,D] -> [B*S,D] is metadata-only (no HBM pass).  x keeps its input dtype; the bf16
    # cast for the MXU happens inside the kernel, so x is streamed from HBM exactly once.
    x2 = last_hidden_state.reshape(B * S, D)
    w1_bf16 = w1t.astype(jnp.bfloat16)

    kernel = functools.partial(_attn_head_kernel, batch_tile=TB, seq_len=S,
                               tanh_dtype=tanh_dtype)

    cost = pl.CostEstimate(
        flops=2 * B * S * D * H + 2 * B * S * (H + D),        # matmul + the two VPU reductions
        transcendentals=B * S * (H + 1),                      # tanh over [B*S,H] + exp over [B*S]
        bytes_accessed=B * S * D * x_bytes + D * H * 2 + (2 * H + D + 1) * 4 + B * 4,
    )

    out = pl.pallas_call(
        kernel,
        out_shape=jax.ShapeDtypeStruct((NB, TB, 1), jnp.float32),
        grid=(NB,),
        in_specs=[
            # x rows for this batch tile: pipelined / double-buffered across the grid.
            # (If profiling shows the DMA exposed on v6e, add pipeline_mode=pl.Buffered(3).)
            pl.BlockSpec((rows, D), lambda i: (i, 0)),
            # Weights/biases: constant block index -> stay resident in VMEM across the grid.
            pl.BlockSpec((D, H), lambda i: (0, 0)),              # W1^T (bf16)
            pl.BlockSpec((1, H), lambda i: (0, 0)),              # b1
            pl.BlockSpec((1, H), lambda i: (0, 0)),              # linear2.weight row
            pl.BlockSpec((1, D), lambda i: (0, 0)),              # regressor.weight row
            pl.BlockSpec(memory_space=pltpu.MemorySpace.SMEM),   # br scalar
        ],
        out_specs=pl.BlockSpec((None, TB, 1), lambda i: (i, 0, 0)),
        compiler_params=pltpu.CompilerParams(
            # Batch tiles are independent -> shard grid across TensorCores (v7x megacore).
            dimension_semantics=("parallel",),
            vmem_limit_bytes=vmem_limit,
        ),
        cost_estimate=cost,
    )(x2, w1_bf16, b1, w2, wr, br)
    return out.reshape(B, 1)


# ---------------------------------------------------------------------------
# References
# ---------------------------------------------------------------------------
def reference_f32(x, w1t, b1, w2, b2, wr, br):
    """Pure f32 reference mirroring the PyTorch module exactly."""
    a = jnp.tanh(x @ w1t + b1)                        # [B,S,H]
    score = a @ w2.T + b2                             # [B,S,1]
    wts = jax.nn.softmax(score, axis=1)               # [B,S,1]
    attn = jnp.sum(wts * x, axis=1)                   # [B,D]
    return attn @ wr.T + br                           # [B,1]


def reference_matched(x, w1t, b1, w2, b2, wr, br, tanh_dtype):
    """Reference with the same bf16-operand / f32-accumulation numerics as the kernel."""
    del b2  # shift-invariant under softmax, dropped in the kernel too
    h = jnp.matmul(x.astype(jnp.bfloat16), w1t.astype(jnp.bfloat16),
                   preferred_element_type=jnp.float32)
    a = jnp.tanh((h + b1).astype(tanh_dtype))                            # [B,S,H]
    score = jnp.sum(a.astype(jnp.float32) * w2, axis=-1, keepdims=True)  # [B,S,1]
    wts = jax.nn.softmax(score, axis=1)
    proj = jnp.sum(x * wr, axis=-1, keepdims=True)                       # [B,S,1] (f32 x)
    return jnp.sum(wts * proj, axis=1) + br                              # [B,1]


if __name__ == "__main__":
    # Small-but-faithful shapes: hidden dims fixed by the module (768 -> 512 -> 1).
    B, S, D, H = 4, 8, 768, 512

    key = jax.random.PRNGKey(0)
    k_x, k_w1, k_b1, k_w2, k_b2, k_wr, k_br = jax.random.split(key, 7)

    # Deterministic nn.Linear-style init (uniform +/- 1/sqrt(fan_in)).
    last_hidden_state = jax.random.normal(k_x, (B, S, D), dtype=jnp.float32)
    s1 = 1.0 / (D ** 0.5)
    s2 = 1.0 / (H ** 0.5)
    w1t = jax.random.uniform(k_w1, (D, H), jnp.float32, -s1, s1)   # linear1.weight.T
    b1 = jax.random.uniform(k_b1, (1, H), jnp.float32, -s1, s1)    # linear1.bias
    w2 = jax.random.uniform(k_w2, (1, H), jnp.float32, -s2, s2)    # linear2.weight
    b2 = jax.random.uniform(k_b2, (1, 1), jnp.float32, -s2, s2)    # linear2.bias
    wr = jax.random.uniform(k_wr, (1, D), jnp.float32, -s1, s1)    # regressor.weight
    br = jax.random.uniform(k_br, (1, 1), jnp.float32, -s1, s1)    # regressor.bias

    out = my_model_attn_head(last_hidden_state, w1t, b1, w2, b2, wr, br, batch_tile=None)
    out = jax.block_until_ready(out)
    assert out.shape == (B, 1)

    # Tight check vs. a reference with matched (bf16-operand, f32-accumulation) numerics.
    tanh_dtype = jnp.float32 if "v5" in _device_kind() else jnp.bfloat16
    ref_m = reference_matched(last_hidden_state, w1t, b1, w2, b2, wr, br, tanh_dtype)
    assert jnp.allclose(out, ref_m, atol=5e-3, rtol=5e-3), (out, ref_m)

    # Looser check vs. the pure-f32 module reference (expected bf16-operand tolerance).
    ref = reference_f32(last_hidden_state, w1t, b1, w2, b2, wr, br)
    assert jnp.allclose(out, ref, atol=3e-2, rtol=3e-2), (out, ref)

    print("KERNEL_OK")
</pallas_src>

<mosaic_0001>
module attributes {stable_mosaic.version = 11 : i64} {
  func.func @_attn_head_kernel(%arg0: i32, %arg1: memref<16x768xf32, #tpu.memory_space<vmem>>, %arg2: memref<768x512xbf16, #tpu.memory_space<vmem>>, %arg3: memref<1x512xf32, #tpu.memory_space<vmem>>, %arg4: memref<1x512xf32, #tpu.memory_space<vmem>>, %arg5: memref<1x768xf32, #tpu.memory_space<vmem>>, %arg6: memref<1x1xf32, #tpu.memory_space<smem>>, %arg7: memref<1x2x1xf32, #tpu.memory_space<vmem>>) attributes {dimension_semantics = [#tpu.dimension_semantics<parallel>], iteration_bounds = array<i64: 2>, scalar_prefetch = 0 : i64, scratch_operands = 0 : i64, tpu.core_type = #tpu.core_type<tc>, window_params = [{transform_indices = @transform_0, window_bounds = array<i64: 16, 768>}, {pipeline_mode = #tpu.pipeline_mode<synchronous>, transform_indices = @transform_1, window_bounds = array<i64: 768, 512>}, {pipeline_mode = #tpu.pipeline_mode<synchronous>, transform_indices = @transform_2, window_bounds = array<i64: 1, 512>}, {pipeline_mode = #tpu.pipeline_mode<synchronous>, transform_indices = @transform_3, window_bounds = array<i64: 1, 512>}, {pipeline_mode = #tpu.pipeline_mode<synchronous>, transform_indices = @transform_4, window_bounds = array<i64: 1, 768>}, {transform_indices = @transform_5, window_bounds = array<i64: 1, 1>}, {transform_indices = @transform_6, window_bounds = array<i64: 1, 2, 1>}]} {
    %c0 = arith.constant 0 : index
    %c0_0 = arith.constant 0 : index
    %0 = vector.load %arg1[%c0, %c0_0] : memref<16x768xf32, #tpu.memory_space<vmem>>, vector<16x768xf32>
    %1 = arith.truncf %0 : vector<16x768xf32> to vector<16x768xbf16>
    %c0_1 = arith.constant 0 : index
    %c0_2 = arith.constant 0 : index
    %2 = vector.load %arg2[%c0_1, %c0_2] : memref<768x512xbf16, #tpu.memory_space<vmem>>, vector<768x512xbf16>
    %cst = arith.constant dense<0.000000e+00> : vector<16x512xf32>
    %3 = tpu.matmul %1, %2, %cst {dimension_numbers = #tpu.dot_dimension_numbers<[1], [0], [0], [1], [0, 0, 1, 1], [], []>} : vector<16x768xbf16>, vector<768x512xbf16>, vector<16x512xf32> -> vector<16x512xf32>
    %c0_3 = arith.constant 0 : index
    %c0_4 = arith.constant 0 : index
    %4 = vector.load %arg3[%c0_3, %c0_4] : memref<1x512xf32, #tpu.memory_space<vmem>>, vector<1x512xf32>
    %5 = vector.broadcast %4 : vector<1x512xf32> to vector<16x512xf32>
    %6 = arith.addf %3, %5 : vector<16x512xf32>
    %7 = arith.truncf %6 : vector<16x512xf32> to vector<16x512xbf16>
    %8 = math.tanh %7 : vector<16x512xbf16>
    %c0_5 = arith.constant 0 : index
    %c0_6 = arith.constant 0 : index
    %9 = vector.load %arg4[%c0_5, %c0_6] : memref<1x512xf32, #tpu.memory_space<vmem>>, vector<1x512xf32>
    %10 = arith.extf %8 : vector<16x512xbf16> to vector<16x512xf32>
    %11 = vector.broadcast %9 : vector<1x512xf32> to vector<16x512xf32>
    %12 = arith.mulf %10, %11 : vector<16x512xf32>
    %cst_7 = arith.constant dense<0.000000e+00> : vector<16xf32>
    %13 = vector.multi_reduction <add>, %12, %cst_7 [1] : vector<16x512xf32> to vector<16xf32>
    %c0_8 = arith.constant 0 : index
    %c0_9 = arith.constant 0 : index
    %14 = vector.load %arg5[%c0_8, %c0_9] : memref<1x768xf32, #tpu.memory_space<vmem>>, vector<1x768xf32>
    %15 = vector.broadcast %14 : vector<1x768xf32> to vector<16x768xf32>
    %16 = arith.mulf %0, %15 : vector<16x768xf32>
    %cst_10 = arith.constant dense<0.000000e+00> : vector<16xf32>
    %17 = vector.multi_reduction <add>, %16, %cst_10 [1] : vector<16x768xf32> to vector<16xf32>
    %18 = vector.shape_cast %13 : vector<16xf32> to vector<2x8xf32>
    %19 = vector.shape_cast %17 : vector<16xf32> to vector<2x8xf32>
    %cst_11 = arith.constant dense<0xFF800000> : vector<2xf32>
    %20 = vector.multi_reduction <maximumf>, %18, %cst_11 [1] : vector<2x8xf32> to vector<2xf32>
    %21 = vector.shape_cast %20 : vector<2xf32> to vector<2x1xf32>
    %22 = vector.broadcast %21 : vector<2x1xf32> to vector<2x8xf32>
    %23 = arith.subf %18, %22 : vector<2x8xf32>
    %24 = math.exp %23 : vector<2x8xf32>
    %cst_12 = arith.constant dense<0.000000e+00> : vector<2xf32>
    %25 = vector.multi_reduction <add>, %24, %cst_12 [1] : vector<2x8xf32> to vector<2xf32>
    %26 = vector.shape_cast %25 : vector<2xf32> to vector<2x1xf32>
    %27 = tpu.reciprocal %26 {approx = true} : vector<2x1xf32> -> vector<2x1xf32>
    %28 = vector.broadcast %27 : vector<2x1xf32> to vector<2x8xf32>
    %29 = arith.mulf %24, %28 : vector<2x8xf32>
    %30 = arith.mulf %29, %19 : vector<2x8xf32>
    %cst_13 = arith.constant dense<0.000000e+00> : vector<2xf32>
    %31 = vector.multi_reduction <add>, %30, %cst_13 [1] : vector<2x8xf32> to vector<2xf32>
    %32 = vector.shape_cast %31 : vector<2xf32> to vector<2x1xf32>
    %c0_14 = arith.constant 0 : index
    %c0_15 = arith.constant 0 : index
    %33 = memref.load %arg6[%c0_14, %c0_15] : memref<1x1xf32, #tpu.memory_space<smem>>
    %34 = vector.broadcast %33 : f32 to vector<2x1xf32>
    %35 = arith.addf %32, %34 : vector<2x1xf32>
    %c0_16 = arith.constant 0 : index
    %c0_17 = arith.constant 0 : index
    %c0_18 = arith.constant 0 : index
    %36 = vector.load %arg7[%c0_16, %c0_17, %c0_18] : memref<1x2x1xf32, #tpu.memory_space<vmem>>, vector<1x2x1xf32>
    %37 = vector.shape_cast %36 : vector<1x2x1xf32> to vector<2x1xf32>
    %38 = vector.shape_cast %35 : vector<2x1xf32> to vector<1x2x1xf32>
    tpu.vector_store %arg7[%c0_16, %c0_17, %c0_18], %38 {strides = array<i32>} : memref<1x2x1xf32, #tpu.memory_space<vmem>>, vector<1x2x1xf32>,
    return
  }
  func.func @transform_0(%arg0: i32) -> (i32, i32) {
    %c0_i32 = arith.constant 0 : i32
    %c0_i32_0 = arith.constant 0 : i32
    return %arg0, %c0_i32 : i32, i32
  }
  func.func @transform_1(%arg0: i32) -> (i32, i32) {
    %c0_i32 = arith.constant 0 : i32
    %c0_i32_0 = arith.constant 0 : i32
    %c0_i32_1 = arith.constant 0 : i32
    return %c0_i32, %c0_i32_0 : i32, i32
  }
  func.func @transform_2(%arg0: i32) -> (i32, i32) {
    %c0_i32 = arith.constant 0 : i32
    %c0_i32_0 = arith.constant 0 : i32
    %c0_i32_1 = arith.constant 0 : i32
    return %c0_i32, %c0_i32_0 : i32, i32
  }
  func.func @transform_3(%arg0: i32) -> (i32, i32) {
    %c0_i32 = arith.constant 0 : i32
    %c0_i32_0 = arith.constant 0 : i32
    %c0_i32_1 = arith.constant 0 : i32
    return %c0_i32, %c0_i32_0 : i32, i32
  }
  func.func @transform_4(%arg0: i32) -> (i32, i32) {
    %c0_i32 = arith.constant 0 : i32
    %c0_i32_0 = arith.constant 0 : i32
    %c0_i32_1 = arith.constant 0 : i32
    return %c0_i32, %c0_i32_0 : i32, i32
  }
  func.func @transform_5(%arg0: i32) -> (i32, i32) {
    %c0_i32 = arith.constant 0 : i32
    %c0_i32_0 = arith.constant 0 : i32
    %c0_i32_1 = arith.constant 0 : i32
    return %c0_i32, %c0_i32_0 : i32, i32
  }
  func.func @transform_6(%arg0: i32) -> (i32, i32, i32) {
    %c0_i32 = arith.constant 0 : i32
    %c0_i32_0 = arith.constant 0 : i32
    %c0_i32_1 = arith.constant 0 : i32
    return %arg0, %c0_i32, %c0_i32_0 : i32, i32, i32
  }
}

</mosaic_0001>

<bundles_post_ra>
// kernel: tpu_custom_call.1
= control target key start
LH: loop header
LB: loop body
LE: loop exit
PB: predicated region body
PF: predicated region fallthrough
CT: control target
= control target key end

     0   :  { %s3023_s0 = inlined_call_operand.hbm [shape: f32[32,768], index: 0, kind: input, shape index: {}]   ;;  %s3024_s1 = inlined_call_operand.hbm [shape: bf16[768,512], index: 1, kind: input, shape index: {}]   ;;  %s3025_s2 = inlined_call_operand.vmem [shape: f32[1,512], index: 2, kind: input, shape index: {}]   ;;  %s3026_s3 = inlined_call_operand.vmem [shape: f32[1,512], index: 3, kind: input, shape index: {}]   ;;  %s3027_s4 = inlined_call_operand.vmem [shape: f32[1,768], index: 4, kind: input, shape index: {}]   ;;  %s3028_s5 = inlined_call_operand.<no memory space> [shape: f32[1,1], index: 5, kind: input, shape index: {}]   ;;  %s3029_s6 = inlined_call_operand.vmem [shape: f32[2,2,1], index: 6, kind: output, shape index: {}]  }
   0x1   :  { %11 = sst [smem:[#allocation2]] %s3028_s5 }
   0x2   :  { %12 = vsyncpa [#allocation4], 0 }
   0x3   :  { %14 = vsyncpa [#allocation4 + $0x1], 0 }
   0x4   :  { %15 = vsyncpa [#allocation6], 0  ;;  %s2760_s23 = smov 0   ;;  %s2762_s24 = smov 0  }
   0x5   :  { %s2764_s25 = smov 0   ;;  %s2766_s26 = smov 0  }
   0x6 LB: > { %s2779_s5 = sadd.s32 4294967295, %s2713_s26   ;;  %p41_p0 = scmp.ne.s32.totalorder %s2705_s24, %s2701_s23  ;;  %s2713_s26 = sphi %s2766_s26, %s3045_s26   ;;  %s2709_s25 = sphi %s2764_s25, %s3044_s25   ;;  %s2705_s24 = sphi %s2762_s24, %s3043_s24   ;;  %s2701_s23 = sphi %s2760_s23, %s3042_s23  }
   0x7   : > { %p3030_p1 = scmp.eq.s32.totalorder %s2779_s5, 0  ;;  %p2027_p2 = scmp.ge.s32.totalorder %s2713_s26, 1 }
   0x8   : > { %p183_p3 = scmp.lt.s32.totalorder %s2713_s26, 3  ;;  %s2715_s29 = smov [#allocation5]  }
   0x9   : > { %p2787_p4 = por %p3030_p1, %p41_p0  ;;  %s195_s30 = sshll.u32 %s2715_s29, 4  ;;  %s196_s30 = int_to_ptr.vmem [resolvable:$true] %s195_s30 }
   0xa   : > { %p2791_p5 = pnand %p2027_p2, %p183_p3  ;;  %s2804_s8 = sadd.s32 1, %s2713_s26  }
   0xb   : > { %s3033_s27 = scalar_select %p2787_p4, 1, 0 }
   0xc   : > { %s3034_s28 = scalar_select %p2791_p5, 1, 0 }
   0xd   : > { %p2263_p6 = pneg %p2791_p5  ;;  %s28_s9 = sadd.s32 1, %s2709_s25 }
   0xe   : > { %s25_s10 = ssub.s32 %s2713_s26, %s2804_s8  ;;  %s2617_s13 = scalar_lea.hbm %s3024_s1, 24576 }
   0xf   : > { %p2799_p7 = pnand %p2263_p6, %p3030_p1  ;;  %p2618_p8 = scmp.ne.s32.totalorder %s3024_s1, %s2617_s13 }
  0x10   : > { %p2624_p12 = scmp.lt.u32.totalorder %s2617_s13, %s3024_s1 }
  0x11   : > { %p2619_p9 = pneg %p2799_p7 }
  0x13   : > { %p2620_p10 = pnand %p2619_p9, %p2618_p8 }
  0x15   : > { %p2621_p11 = pneg %p2620_p10 }
  0x17   : > { %p2626_p13 = pnand %p2624_p12, %p2621_p11 }
  0x19   : > { %2629 = shalt.err (!%p2626_p13)
}
  0x1a   : > { %s2630_s18 = scalar_lea.vmem %s196_s30, 24576  ;;  %p2638_p6 = scmp.lt.s32.totalorder %s196_s30, %s196_s30 }
  0x1b   : > { %p2631_p0 = scmp.ne.s32.totalorder %s196_s30, %s2630_s18  ;;  %p2639_p1 = scmp.lt.s32.totalorder %s2630_s18, %s2630_s18 }
  0x1d   : > { %p2633_p2 = pnand %p2631_p0, %p2619_p9  ;;  %p2640_p4 = por %p2639_p1, %p2638_p6 }
  0x1f   : > { %p2634_p3 = pneg %p2633_p2 }
  0x21   : > { %p2641_p5 = pnand %p2640_p4, %p2634_p3 }
  0x23   : > { %2644 = shalt.err (!%p2641_p5)
}
  0x24   : > { %s2716_s19 = smov 256   ;;  %s2717_s20 = smov 16  }
  0x25   : > { %2266 = dma.hbm_to_vmem [thread:$0]  (!%p2799_p7), %s3024_s1, 24576, %s196_s30, [#allocation6], %s2716_s19, %s2716_s19, %s2717_s20  }
  0x26   : > { %p26_p8 = scmp.eq.s32.totalorder %s25_s10, 0  ;;  %p35_p9 = scmp.ne.s32.totalorder %s2709_s25, %s2705_s24 }
  0x27   : > { %p36_p1 = scmp.eq.s32.totalorder %s2713_s26, 0  ;;  %p2272_p4 = scmp.lt.s32.totalorder %s2713_s26, 2 }
  0x28   : > { %s2830_s23 = scalar_select %p26_p8, %s2709_s25, %s28_s9  }
  0x29   : > { %p37_p5 = por %p36_p1, %p35_p9  ;;  %s221_s29 = sand.u32 1, %s2709_s25  }
  0x2a   : > { %s2254_s11 = smul.u32 96, %s221_s29  ;;  %s2650_s18 = scalar_lea.hbm %s3023_s0, 3072 }
  0x2b   : > { %s2255_s12 = smul.u32 1536, %s2713_s26  ;;  %p2834_p10 = pnand %p2272_p4, %p37_p5 }
  0x2c   : > { %s225_s9 = scalar_lea.vmem [#allocation3], %s2254_s11  ;;  %s2845_s26 = scalar_lea.sflag [#allocation4], %s221_s29 }
  0x2d   : > { %s2841_s30 = scalar_lea.hbm %s3023_s0, %s2255_s12  ;;  %s233_s10 = sshll.u32 %s225_s9, 4  ;;  %s2843_s10 = int_to_ptr.vmem [resolvable:$true] %s233_s10 }
  0x2e   : > { %s2645_s15 = scalar_lea.hbm %s2841_s30, 1536  ;;  %p2647_p11 = pneg %p2834_p10 }
  0x2f   : > { %p2646_p7 = scmp.ne.s32.totalorder %s2841_s30, %s2645_s15  ;;  %p2651_p0 = scmp.lt.u32.totalorder %s2841_s30, %s3023_s0 }
  0x30   : > { %p2652_p2 = scmp.lt.u32.totalorder %s2650_s18, %s2645_s15  ;;  %p2654_p6 = scmp.lt.u32.totalorder %s2645_s15, %s2841_s30 }
  0x31   : > { %p2648_p12 = pnand %p2647_p11, %p2646_p7 }
  0x32   : > { %p2653_p3 = por %p2652_p2, %p2651_p0 }
  0x33   : > { %p2649_p13 = pneg %p2648_p12 }
  0x34   : > { %p2655_p8 = por %p2654_p6, %p2653_p3 }
  0x36   : > { %p2656_p9 = pnand %p2655_p8, %p2649_p13 }
  0x38   : > { %2659 = shalt.err (!%p2656_p9)
}
  0x39   : > { %s2660_s21 = scalar_lea.vmem %s2843_s10, 1536  ;;  %s2718_s22 = smov [#allocation3]  }
  0x3a   : > { %p2661_p1 = scmp.ne.s32.totalorder %s2843_s10, %s2660_s21  ;;  %s2665_s29 = sshll.u32 %s2718_s22, 4  ;;  %s2666_s29 = int_to_ptr.vmem [resolvable:$false] %s2665_s29 }
  0x3b   : > { %s2667_s11 = scalar_lea.vmem %s2666_s29, 3072  ;;  %p2668_p7 = scmp.lt.s32.totalorder %s2843_s10, %s2666_s29 }
  0x3c   : > { %p2663_p4 = pnand %p2661_p1, %p2647_p11  ;;  %p2669_p12 = scmp.lt.s32.totalorder %s2667_s11, %s2660_s21 }
  0x3e   : > { %p2664_p5 = pneg %p2663_p4  ;;  %p2670_p0 = por %p2669_p12, %p2668_p7 }
  0x40   : > { %p2671_p2 = pnand %p2670_p0, %p2664_p5 }
  0x42   : > { %2674 = shalt.err (!%p2671_p2)
}
  0x43   : > { %s2719_s12 = smov 768   ;;  %s2720_s14 = smov 48  }
  0x44   : > { %2270 = dma.hbm_to_vmem [thread:$0]  (!%p2834_p10), %s2841_s30, 1536, %s2843_s10, %s2845_s26, %s2719_s12, %s2719_s12, %s2720_s14  }
  0x45   : > { %p3037_p11 = scmp.ne.s32.totalorder %s3034_s28, 0 }
  0x46   : > { %s247_s7 = sand.u32 (!%p3037_p11), 1, %s2705_s24   ;;  %p3038_p13 = scmp.ne.s32.totalorder (!%p3037_p11), %s3033_s27, 0 }
  0x47   : > { %245 = sbr.rel (%p3037_p11) target bundleno = 1399 (0x577), region = 44  ;;  %s248_s15 = scalar_lea.sflag (!%p3037_p11), [#allocation4], %s247_s7 }
  0x48   : > { %s2256_s9 = smul.u32 (!%p3037_p11), 96, %s247_s7 }
  0x4a   : > { %s2876_s16 = scalar_lea.vmem (!%p3037_p11), [#allocation3], %s2256_s9 }
  0x4e   : > { %2692 = dma.done.wait (%p3038_p13), %s248_s15, 1536  }
  0x4f   : > { %2694 = vsyncadd (%p3038_p13), %s248_s15, 4294965760  ;;  %p3039_p3 = scmp.eq.s32.totalorder %s2779_s5, 0 }
  0x51   : > { %2696 = dma.done.wait (%p3039_p3), [#allocation6], 24576   ;;  %p3040_p10 = pmov %p3039_p3 }
  0x52   : > { %v2314_v0 = vld [vmem:[#allocation5 + $0x4] ss:$16 sps:$4 sm:$0xff]   ;;  %v2316_v1 = vld [vmem:[#allocation5 + $0xc] ss:$16 sps:$4 sm:$0xff]   ;;  %v2318_v2 = vld [vmem:[#allocation5] ss:$16 sps:$4 sm:$0xff]   ;;  %v500_v38 = vlaneseq }
  0x53   : > { %2698 = vsyncadd (%p3040_p10), [#allocation6], 4294942720  ;;  %1480 = vmatprep.subr.bf16.mxu0 %v2314_v0  ;;  %v2319_v3 = vld [vmem:[#allocation5 + $0x8] ss:$16 sps:$4 sm:$0xff]   ;;  %1609 = vmatprep.subr.bf16.mxu1 %v2316_v1  ;;  %v2320_v4 = vld [vmem:[#allocation5 + $0x24] ss:$16 sps:$4 sm:$0xff]  }
  0x54   : > { %1481 = vmatpush1.bf16.msra.mxu0 %v2318_v2  ;;  %1610 = vmatpush1.bf16.msra.mxu1 %v2319_v3  ;;  %v2322_v5 = vld [vmem:[#allocation5 + $0x2c] ss:$16 sps:$4 sm:$0xff]   ;;  %v2324_v6 = vld [vmem:[#allocation5 + $0x20] ss:$16 sps:$4 sm:$0xff]   ;;  %v2325_v7 = vld [vmem:[#allocation5 + $0x28] ss:$16 sps:$4 sm:$0xff]  }
  0x55   : > { %1482 = vmatprep.subr.bf16.mxu0 %v2320_v4  ;;  %1611 = vmatprep.subr.bf16.mxu1 %v2322_v5  ;;  %v2326_v8 = vld [vmem:[#allocation5 + $0x44] ss:$16 sps:$4 sm:$0xff]   ;;  %v2328_v9 = vld [vmem:[#allocation5 + $0x4c] ss:$16 sps:$4 sm:$0xff]   ;;  %v2330_v10 = vld [vmem:[#allocation5 + $0x40] ss:$16 sps:$4 sm:$0xff]  }
  0x56   : > { %v2331_v11 = vld [vmem:[#allocation5 + $0x48] ss:$16 sps:$4 sm:$0xff]   ;;  %v2332_v12 = vld [vmem:[#allocation5 + $0x64] ss:$16 sps:$4 sm:$0xff]   ;;  %v2334_v13 = vld [vmem:[#allocation5 + $0x6c] ss:$16 sps:$4 sm:$0xff]  }
  0x57   : > { %v2336_v14 = vld [vmem:[#allocation5 + $0x60] ss:$16 sps:$4 sm:$0xff]   ;;  %v2337_v15 = vld [vmem:[#allocation5 + $0x68] ss:$16 sps:$4 sm:$0xff]   ;;  %v2338_v16 = vld [vmem:[#allocation5 + $0x84] ss:$16 sps:$4 sm:$0xff]  }
  0x58   : > { %1483 = vmatpush1.bf16.msra.mxu0 %v2324_v6  ;;  %1612 = vmatpush1.bf16.msra.mxu1 %v2325_v7  ;;  %v2340_v17 = vld [vmem:[#allocation5 + $0x8c] ss:$16 sps:$4 sm:$0xff]   ;;  %v2342_v18 = vld [vmem:[#allocation5 + $0x80] ss:$16 sps:$4 sm:$0xff]   ;;  %v2343_v19 = vld [vmem:[#allocation5 + $0x88] ss:$16 sps:$4 sm:$0xff]  }
  0x59   : > { %1484 = vmatprep.subr.bf16.mxu0 %v2326_v8  ;;  %1613 = vmatprep.subr.bf16.mxu1 %v2328_v9  ;;  %v2344_v20 = vld [vmem:[#allocation5 + $0xa4] ss:$16 sps:$4 sm:$0xff]   ;;  %v2346_v21 = vld [vmem:[#allocation5 + $0xac] ss:$16 sps:$4 sm:$0xff]   ;;  %v2348_v22 = vld [vmem:[#allocation5 + $0xa0] ss:$16 sps:$4 sm:$0xff]  }
  0x5a   : > { %v2349_v23 = vld [vmem:[#allocation5 + $0xa8] ss:$16 sps:$4 sm:$0xff]   ;;  %v2350_v24 = vld [vmem:[#allocation5 + $0xc4] ss:$16 sps:$4 sm:$0xff]   ;;  %v2352_v25 = vld [vmem:[#allocation5 + $0xcc] ss:$16 sps:$4 sm:$0xff]  }
  0x5b   : > { %v2354_v26 = vld [vmem:[#allocation5 + $0xc0] ss:$16 sps:$4 sm:$0xff]   ;;  %v2355_v27 = vld [vmem:[#allocation5 + $0xc8] ss:$16 sps:$4 sm:$0xff]   ;;  %v2356_v28 = vld [vmem:[#allocation5 + $0xe4] ss:$16 sps:$4 sm:$0xff]  }
  0x5c   : > { %1485 = vmatpush1.bf16.msra.mxu0 %v2330_v10  ;;  %1614 = vmatpush1.bf16.msra.mxu1 %v2331_v11  ;;  %v2358_v29 = vld [vmem:[#allocation5 + $0xec] ss:$16 sps:$4 sm:$0xff]   ;;  %v2360_v30 = vld [vmem:[#allocation5 + $0xe0] ss:$16 sps:$4 sm:$0xff]   ;;  %v2361_v31 = vld [vmem:[#allocation5 + $0xe8] ss:$16 sps:$4 sm:$0xff]  }
  0x5d   : > { %1486 = vmatprep.subr.bf16.mxu0 %v2332_v12  ;;  %1615 = vmatprep.subr.bf16.mxu1 %v2334_v13  ;;  %v2362_v32 = vld [vmem:[#allocation5 + $0x104] ss:$16 sps:$4 sm:$0xff]   ;;  %v2364_v33 = vld [vmem:[#allocation5 + $0x10c] ss:$16 sps:$4 sm:$0xff]   ;;  %v2366_v34 = vld [vmem:[#allocation5 + $0x100] ss:$16 sps:$4 sm:$0xff]  }
  0x5e   : > { %v2367_v35 = vld [vmem:[#allocation5 + $0x108] ss:$16 sps:$4 sm:$0xff]   ;;  %v2368_v36 = vld [vmem:[#allocation5 + $0x124] ss:$16 sps:$4 sm:$0xff]   ;;  %v2370_v37 = vld [vmem:[#allocation5 + $0x12c] ss:$16 sps:$4 sm:$0xff]  }
  0x5f   : > { %v2372_v39 = vld [vmem:[#allocation5 + $0x120] ss:$16 sps:$4 sm:$0xff]   ;;  %v2373_v40 = vld [vmem:[#allocation5 + $0x128] ss:$16 sps:$4 sm:$0xff]   ;;  %v2374_v41 = vld [vmem:[#allocation5 + $0x144] ss:$16 sps:$4 sm:$0xff]  }
  0x60   : > { %1487 = vmatpush1.bf16.msra.mxu0 %v2336_v14  ;;  %1616 = vmatpush1.bf16.msra.mxu1 %v2337_v15  ;;  %v2376_v42 = vld [vmem:[#allocation5 + $0x14c] ss:$16 sps:$4 sm:$0xff]   ;;  %v2887_v43 = vshrl.u32 %v500_v38, 7  ;;  %v2378_v44 = vld [vmem:[#allocation5 + $0x140] ss:$16 sps:$4 sm:$0xff]   ;;  %vm1864_vm0 = vcmask 1041409  }
  0x61   : > { %1488 = vmatprep.subr.bf16.mxu0 %v2338_v16  ;;  %1617 = vmatprep.subr.bf16.mxu1 %v2340_v17  ;;  %v2379_v45 = vld [vmem:[#allocation5 + $0x148] ss:$16 sps:$4 sm:$0xff]   ;;  %v2380_v46 = vld [vmem:[#allocation5 + $0x164] ss:$16 sps:$4 sm:$0xff]   ;;  %v2382_v47 = vld [vmem:[#allocation5 + $0x16c] ss:$16 sps:$4 sm:$0xff]  }
  0x62   : > { %v2384_v48 = vld [vmem:[#allocation5 + $0x160] ss:$16 sps:$4 sm:$0xff]   ;;  %v289_v49 = vld [vmem:[%s2876_s16 + $0x8] sm:$0xff]  ;;  %v2891_v50 = vsub.s32 1, %v2887_v43  ;;  %v2894_v51 = vsub.s32 0, %v2887_v43  ;;  %v295_v52 = vld [vmem:[%s2876_s16 + $0x38] sm:$0xff] }
  0x63   : > { %v2900_v53 = vld [vmem:[%s3027_s4] sm:$0x3f]  ;;  %v2385_v54 = vld [vmem:[#allocation5 + $0x168] ss:$16 sps:$4 sm:$0xff]   ;;  %v301_v56 = vpack.c.bf16 %v295_v52, %v289_v49  ;;  %v2388_v59 = vld [vmem:[#allocation5 + $0x18c] ss:$16 sps:$4 sm:$0xff]  }
  0x64   : > { %1489 = vmatpush1.bf16.msra.mxu0 %v2342_v18  ;;  %1618 = vmatpush1.bf16.msra.mxu1 %v2343_v19  ;;  %v2386_v55 = vld [vmem:[#allocation5 + $0x184] ss:$16 sps:$4 sm:$0xff]   ;;  %v1803_v57 = vrot.slane %v2900_v53, %v2891_v50  ;;  %v1799_v58 = vrot.slane %v2900_v53, %v2894_v51  ;;  %v2390_v0 = vld [vmem:[#allocation5 + $0x180] ss:$16 sps:$4 sm:$0xff]   ;;  %v2391_v3 = vld [vmem:[#allocation5 + $0x188] ss:$16 sps:$4 sm:$0xff]  }
  0x65   : > { %1490 = vmatprep.subr.bf16.mxu0 %v2344_v20  ;;  %1619 = vmatprep.subr.bf16.mxu1 %v2346_v21  ;;  %v288_v62 = vld [vmem:[%s2876_s16] sm:$0xff]  ;;  %v294_v63 = vld [vmem:[%s2876_s16 + $0x30] sm:$0xff]  ;;  %v2394_v5 = vld [vmem:[#allocation5 + $0x1ac] ss:$16 sps:$4 sm:$0xff]   ;;  %vm1867_vm1 = vcmask 58368   ;;  %p284_p6 = scmp.lt.s32.totalorder %s2779_s5, 1 }
  0x66   : > { %1512 = vmatprep.mubr.bf16.mxu0 %v301_v56  ;;  %v1827_v60 = vmul.f32 %v1803_v57, %v289_v49  ;;  %v1833_v61 = vmul.f32 %v1803_v57, %v295_v52  ;;  %1641 = vmatprep.mubr.bf16.mxu1 %v301_v56  ;;  %v1826_v1 = vmul.f32 %v1799_v58, %v288_v62  ;;  %v2392_v4 = vld [vmem:[#allocation5 + $0x1a4] ss:$16 sps:$4 sm:$0xff]   ;;  %v2396_v8 = vld [vmem:[#allocation5 + $0x1a0] ss:$16 sps:$4 sm:$0xff]   ;;  %v2397_v9 = vld [vmem:[#allocation5 + $0x1a8] ss:$16 sps:$4 sm:$0xff]  }
  0x67   : > { %v1832_v2 = vmul.f32 %v1799_v58, %v294_v63  ;;  %v2398_v10 = vld [vmem:[#allocation5 + $0x1c4] ss:$16 sps:$4 sm:$0xff]   ;;  %v2400_v11 = vld [vmem:[#allocation5 + $0x1cc] ss:$16 sps:$4 sm:$0xff]   ;;  %v2402_v12 = vld [vmem:[#allocation5 + $0x1c0] ss:$16 sps:$4 sm:$0xff]   ;;  %v300_v21 = vpack.c.bf16 %v294_v63, %v288_v62 }
  0x68   : > { %1491 = vmatpush1.bf16.msra.mxu0 %v2348_v22  ;;  %1620 = vmatpush1.bf16.msra.mxu1 %v2349_v23  ;;  %v2908_v6 = vadd.f32 %v1827_v60, %v1826_v1  ;;  %v2403_v13 = vld [vmem:[#allocation5 + $0x1c8] ss:$16 sps:$4 sm:$0xff]   ;;  %v2404_v14 = vld [vmem:[#allocation5 + $0x1e4] ss:$16 sps:$4 sm:$0xff]   ;;  %v2406_v15 = vld [vmem:[#allocation5 + $0x1ec] ss:$16 sps:$4 sm:$0xff]  }
  0x69   : > { %1492 = vmatprep.subr.bf16.mxu0 %v2350_v24  ;;  %1621 = vmatprep.subr.bf16.mxu1 %v2352_v25  ;;  %v2910_v7 = vadd.f32 %v1833_v61, %v1832_v2  ;;  %v2408_v16 = vld [vmem:[#allocation5 + $0x1e0] ss:$16 sps:$4 sm:$0xff]   ;;  %v2409_v17 = vld [vmem:[#allocation5 + $0x1e8] ss:$16 sps:$4 sm:$0xff]   ;;  %v2412_v18 = vld [vmem:[#allocation5 + $0x204] ss:$16 sps:$4 sm:$0xff]  }
  0x6a   : > { %v2415_v19 = vld [vmem:[#allocation5 + $0x20c] ss:$16 sps:$4 sm:$0xff]   ;;  %v2410_v20 = vld [vmem:[#allocation5 + $0x200] ss:$16 sps:$4 sm:$0xff]   ;;  %v2413_v22 = vld [vmem:[#allocation5 + $0x208] ss:$16 sps:$4 sm:$0xff]  }
  0x6b   : > { %v2418_v23 = vld [vmem:[#allocation5 + $0x224] ss:$16 sps:$4 sm:$0xff]   ;;  %v2421_v24 = vld [vmem:[#allocation5 + $0x22c] ss:$16 sps:$4 sm:$0xff]   ;;  %v2416_v25 = vld [vmem:[#allocation5 + $0x220] ss:$16 sps:$4 sm:$0xff]  }
  0x6c   : > { %1493 = vmatpush1.bf16.msra.mxu0 %v2354_v26  ;;  %1622 = vmatpush1.bf16.msra.mxu1 %v2355_v27  ;;  %v2419_v26 = vld [vmem:[#allocation5 + $0x228] ss:$16 sps:$4 sm:$0xff]   ;;  %v2424_v27 = vld [vmem:[#allocation5 + $0x244] ss:$16 sps:$4 sm:$0xff]   ;;  %v2446_v49 = vld [vmem:[#allocation5 + $0x2c0] ss:$16 sps:$4 sm:$0xff]  }
  0x6d   : > { %1494 = vmatprep.subr.bf16.mxu0 %v2356_v28  ;;  %1623 = vmatprep.subr.bf16.mxu1 %v2358_v29  ;;  %v2427_v28 = vld [vmem:[#allocation5 + $0x24c] ss:$16 sps:$4 sm:$0xff]   ;;  %v2422_v29 = vld [vmem:[#allocation5 + $0x240] ss:$16 sps:$4 sm:$0xff]   ;;  %v2454_v56 = vld [vmem:[#allocation5 + $0x2e4] ss:$16 sps:$4 sm:$0xff]  }
  0x6e   : > { %v2920_v52 = vld [vmem:[%s2876_s16 + $0x18] sm:$0xff]  ;;  %v2460_v61 = vld [vmem:[#allocation5 + $0x304] ss:$16 sps:$4 sm:$0xff]   ;;  %v2458_v63 = vld [vmem:[#allocation5 + $0x300] ss:$16 sps:$4 sm:$0xff]   ;;  %s1946_s19 = sld [smem:[#allocation2]] }
  0x6f   : > { %v2455_v60 = vld [vmem:[#allocation5 + $0x2e8] ss:$16 sps:$4 sm:$0xff]   ;;  %v2463_v62 = vld [vmem:[#allocation5 + $0x30c] ss:$16 sps:$4 sm:$0xff]   ;;  %v2466_v1 = vld [vmem:[#allocation5 + $0x324] ss:$16 sps:$4 sm:$0xff]  }
  0x70   : > { %1495 = vmatpush1.bf16.msra.mxu0 %v2360_v30  ;;  %1624 = vmatpush1.bf16.msra.mxu1 %v2361_v31  ;;  %v2425_v30 = vld [vmem:[#allocation5 + $0x248] ss:$16 sps:$4 sm:$0xff]   ;;  %v2430_v31 = vld [vmem:[#allocation5 + $0x264] ss:$16 sps:$4 sm:$0xff]   ;;  %v2469_v2 = vld [vmem:[#allocation5 + $0x32c] ss:$16 sps:$4 sm:$0xff]  }
  0x71   : > { %1496 = vmatprep.subr.bf16.mxu0 %v2362_v32  ;;  %1625 = vmatprep.subr.bf16.mxu1 %v2364_v33  ;;  %v2433_v32 = vld [vmem:[#allocation5 + $0x26c] ss:$16 sps:$4 sm:$0xff]   ;;  %v2428_v33 = vld [vmem:[#allocation5 + $0x260] ss:$16 sps:$4 sm:$0xff]   ;;  %s3047_s5 = smov (!%p284_p6, %s2779_s5), 1  ;;  %vm1949_vm2 = vcmask 1024  }
  0x72   : > { %s2035_s20 = sshll.u32 %s3047_s5, 1 }
  0x73   : > { %s287_s29 = scalar_lea.vmem %s3029_s6, %s2035_s20 }
  0x74   : > { %1497 = vmatpush1.bf16.msra.mxu0 %v2366_v34  ;;  %1626 = vmatpush1.bf16.msra.mxu1 %v2367_v35  ;;  %v2431_v34 = vld [vmem:[#allocation5 + $0x268] ss:$16 sps:$4 sm:$0xff]   ;;  %v2436_v35 = vld [vmem:[#allocation5 + $0x284] ss:$16 sps:$4 sm:$0xff]  }
  0x75   : > { %1498 = vmatprep.subr.bf16.mxu0 %v2368_v36  ;;  %1627 = vmatprep.subr.bf16.mxu1 %v2370_v37  ;;  %v2439_v36 = vld [vmem:[#allocation5 + $0x28c] ss:$16 sps:$4 sm:$0xff]   ;;  %v2434_v37 = vld [vmem:[#allocation5 + $0x280] ss:$16 sps:$4 sm:$0xff]  }
  0x78   : > { %1499 = vmatpush1.bf16.msra.mxu0 %v2372_v39  ;;  %1628 = vmatpush1.bf16.msra.mxu1 %v2373_v40  ;;  %v2437_v39 = vld [vmem:[#allocation5 + $0x288] ss:$16 sps:$4 sm:$0xff]   ;;  %v2442_v40 = vld [vmem:[#allocation5 + $0x2a4] ss:$16 sps:$4 sm:$0xff]  }
  0x79   : > { %1500 = vmatprep.subr.bf16.mxu0 %v2374_v41  ;;  %1629 = vmatprep.subr.bf16.mxu1 %v2376_v42  ;;  %v2445_v41 = vld [vmem:[#allocation5 + $0x2ac] ss:$16 sps:$4 sm:$0xff]   ;;  %v2913_v42 = vsub.s32 3, %v2887_v43 }
  0x7c   : > { %1501 = vmatpush1.bf16.msra.mxu0 %v2378_v44  ;;  %1630 = vmatpush1.bf16.msra.mxu1 %v2379_v45  ;;  %v2440_v44 = vld [vmem:[#allocation5 + $0x2a0] ss:$16 sps:$4 sm:$0xff]   ;;  %v2443_v45 = vld [vmem:[#allocation5 + $0x2a8] ss:$16 sps:$4 sm:$0xff]  }
  0x7d   : > { %1502 = vmatprep.subr.bf16.mxu0 %v2380_v46  ;;  %1631 = vmatprep.subr.bf16.mxu1 %v2382_v47  ;;  %v2917_v46 = vrot.slane %v2900_v53, %v2913_v42  ;;  %v2448_v47 = vld [vmem:[#allocation5 + $0x2c4] ss:$16 sps:$4 sm:$0xff]   ;;  %v2457_v53 = vld [vmem:[#allocation5 + $0x2ec] ss:$16 sps:$4 sm:$0xff]  }
  0x80   : > { %1503 = vmatpush1.bf16.msra.mxu0 %v2384_v48  ;;  %1632 = vmatpush1.bf16.msra.mxu1 %v2385_v54  ;;  %v2451_v48 = vld [vmem:[#allocation5 + $0x2cc] ss:$16 sps:$4 sm:$0xff]  }
  0x81   : > { %1504 = vmatprep.subr.bf16.mxu0 %v2386_v55  ;;  %1633 = vmatprep.subr.bf16.mxu1 %v2388_v59  ;;  %v297_v54 = vld [vmem:[%s2876_s16 + $0x48] sm:$0xff]  ;;  %v2452_v59 = vld [vmem:[#allocation5 + $0x2e0] ss:$16 sps:$4 sm:$0xff]  }
  0x82   : > { %v2449_v55 = vld [vmem:[#allocation5 + $0x2c8] ss:$16 sps:$4 sm:$0xff]   ;;  %v303_v57 = vpack.c.bf16 %v297_v54, %v2920_v52  ;;  %v2925_v58 = vmul.f32 %v2917_v46, %v297_v54  ;;  %v2523_v54 = vld [vmem:[#allocation5 + $0x44c] ss:$16 sps:$4 sm:$0xff]  }
  0x84   : > { %1505 = vmatpush1.bf16.msra.mxu0 %v2390_v0  ;;  %1634 = vmatpush1.bf16.msra.mxu1 %v2391_v3  ;;  %v2461_v0 = vld [vmem:[#allocation5 + $0x308] ss:$16 sps:$4 sm:$0xff]   ;;  %v2464_v3 = vld [vmem:[#allocation5 + $0x320] ss:$16 sps:$4 sm:$0xff]  }
  0x85   : > { %1506 = vmatprep.subr.bf16.mxu0 %v2392_v4  ;;  %1635 = vmatprep.subr.bf16.mxu1 %v2394_v5  ;;  %v2467_v4 = vld [vmem:[#allocation5 + $0x328] ss:$16 sps:$4 sm:$0xff]   ;;  %v2472_v5 = vld [vmem:[#allocation5 + $0x344] ss:$16 sps:$4 sm:$0xff]  }
  0x88   : > { %1507 = vmatpush1.bf16.msra.mxu0 %v2396_v8  ;;  %1636 = vmatpush1.bf16.msra.mxu1 %v2397_v9  ;;  %v2475_v8 = vld [vmem:[#allocation5 + $0x34c] ss:$16 sps:$4 sm:$0xff]   ;;  %v2470_v9 = vld [vmem:[#allocation5 + $0x340] ss:$16 sps:$4 sm:$0xff]  }
  0x89   : > { %1508 = vmatprep.subr.bf16.mxu0 %v2398_v10  ;;  %1637 = vmatprep.subr.bf16.mxu1 %v2400_v11  ;;  %v2473_v10 = vld [vmem:[#allocation5 + $0x348] ss:$16 sps:$4 sm:$0xff]   ;;  %v2478_v11 = vld [vmem:[#allocation5 + $0x364] ss:$16 sps:$4 sm:$0xff]  }
  0x8c   : > { %1509 = vmatpush1.bf16.msra.mxu0 %v2402_v12  ;;  %1638 = vmatpush1.bf16.msra.mxu1 %v2403_v13  ;;  %v2481_v12 = vld [vmem:[#allocation5 + $0x36c] ss:$16 sps:$4 sm:$0xff]   ;;  %v2476_v13 = vld [vmem:[#allocation5 + $0x360] ss:$16 sps:$4 sm:$0xff]  }
  0x8d   : > { %1510 = vmatprep.subr.bf16.mxu0 %v2404_v14  ;;  %1639 = vmatprep.subr.bf16.mxu1 %v2406_v15  ;;  %v2479_v14 = vld [vmem:[#allocation5 + $0x368] ss:$16 sps:$4 sm:$0xff]   ;;  %v2484_v15 = vld [vmem:[#allocation5 + $0x384] ss:$16 sps:$4 sm:$0xff]  }
  0x90   : > { %1511 = vmatpush1.bf16.msra.mxu0 %v2408_v16  ;;  %1640 = vmatpush1.bf16.msra.mxu1 %v2409_v17  ;;  %v2487_v16 = vld [vmem:[#allocation5 + $0x38c] ss:$16 sps:$4 sm:$0xff]   ;;  %v2482_v17 = vld [vmem:[#allocation5 + $0x380] ss:$16 sps:$4 sm:$0xff]  }
  0x91   : > { %1523 = vmatprep.subr.bf16.mxu0 %v2412_v18  ;;  %1652 = vmatprep.subr.bf16.mxu1 %v2415_v19  ;;  %v2485_v18 = vld [vmem:[#allocation5 + $0x388] ss:$16 sps:$4 sm:$0xff]   ;;  %v2490_v19 = vld [vmem:[#allocation5 + $0x3a4] ss:$16 sps:$4 sm:$0xff]  }
  0x93   : > { %1513 = vmatmul.mubr.bf16.vlgmr.msra.gmra.mrb[0].mxu0 %v300_v21  ;;  %1642 = vmatmul.mubr.bf16.vlgmr.msra.gmra.mrb[0].mxu1 %v300_v21  ;;  %v2488_v21 = vld [vmem:[#allocation5 + $0x3a0] ss:$16 sps:$4 sm:$0xff]  }
  0x94   : > { %1524 = vmatpush1.bf16.msra.mxu0 %v2410_v20  ;;  %1653 = vmatpush1.bf16.msra.mxu1 %v2413_v22  ;;  %v2493_v20 = vld [vmem:[#allocation5 + $0x3ac] ss:$16 sps:$4 sm:$0xff]   ;;  %v2491_v22 = vld [vmem:[#allocation5 + $0x3a8] ss:$16 sps:$4 sm:$0xff]  }
  0x95   : > { %1525 = vmatprep.subr.bf16.mxu0 %v2418_v23  ;;  %1654 = vmatprep.subr.bf16.mxu1 %v2421_v24  ;;  %v2496_v23 = vld [vmem:[#allocation5 + $0x3c4] ss:$16 sps:$4 sm:$0xff]   ;;  %v2499_v24 = vld [vmem:[#allocation5 + $0x3cc] ss:$16 sps:$4 sm:$0xff]  }
  0x96   : > { %1555 = vmatprep.mubr.bf16.mxu0 %v303_v57  ;;  %1684 = vmatprep.mubr.bf16.mxu1 %v303_v57  ;;  %v2526_v57 = vld [vmem:[#allocation5 + $0x464] ss:$16 sps:$4 sm:$0xff]  }
  0x98   : > { %1526 = vmatpush1.bf16.msra.mxu0 %v2416_v25  ;;  %1655 = vmatpush1.bf16.msra.mxu1 %v2419_v26  ;;  %v2494_v25 = vld [vmem:[#allocation5 + $0x3c0] ss:$16 sps:$4 sm:$0xff]   ;;  %v2497_v26 = vld [vmem:[#allocation5 + $0x3c8] ss:$16 sps:$4 sm:$0xff]  }
  0x99   : > { %1527 = vmatprep.subr.bf16.mxu0 %v2424_v27  ;;  %1656 = vmatprep.subr.bf16.mxu1 %v2427_v28  ;;  %v2502_v27 = vld [vmem:[#allocation5 + $0x3e4] ss:$16 sps:$4 sm:$0xff]   ;;  %v2505_v28 = vld [vmem:[#allocation5 + $0x3ec] ss:$16 sps:$4 sm:$0xff]  }
  0x9c   : > { %1528 = vmatpush1.bf16.msra.mxu0 %v2422_v29  ;;  %1657 = vmatpush1.bf16.msra.mxu1 %v2425_v30  ;;  %v2500_v29 = vld [vmem:[#allocation5 + $0x3e0] ss:$16 sps:$4 sm:$0xff]   ;;  %v2503_v30 = vld [vmem:[#allocation5 + $0x3e8] ss:$16 sps:$4 sm:$0xff]  }
  0x9d   : > { %1529 = vmatprep.subr.bf16.mxu0 %v2430_v31  ;;  %1658 = vmatprep.subr.bf16.mxu1 %v2433_v32  ;;  %v2928_v31 = vld [vmem:[%s2876_s16 + $0x10] sm:$0xff]  ;;  %v2931_v32 = vld [vmem:[%s2876_s16 + $0x40] sm:$0xff] }
  0xa0   : > { %1530 = vmatpush1.bf16.msra.mxu0 %v2428_v33  ;;  %1659 = vmatpush1.bf16.msra.mxu1 %v2431_v34  ;;  %v2508_v33 = vld [vmem:[#allocation5 + $0x404] ss:$16 sps:$4 sm:$0xff]   ;;  %v2511_v34 = vld [vmem:[#allocation5 + $0x40c] ss:$16 sps:$4 sm:$0xff]  }
  0xa1   : > { %1531 = vmatprep.subr.bf16.mxu0 %v2436_v35  ;;  %1660 = vmatprep.subr.bf16.mxu1 %v2439_v36  ;;  %v2506_v35 = vld [vmem:[#allocation5 + $0x400] ss:$16 sps:$4 sm:$0xff]   ;;  %v302_v36 = vpack.c.bf16 %v2931_v32, %v2928_v31 }
  0xa4   : > { %1532 = vmatpush1.bf16.msra.mxu0 %v2434_v37  ;;  %1661 = vmatpush1.bf16.msra.mxu1 %v2437_v39  ;;  %v2509_v37 = vld [vmem:[#allocation5 + $0x408] ss:$16 sps:$4 sm:$0xff]   ;;  %v2514_v39 = vld [vmem:[#allocation5 + $0x424] ss:$16 sps:$4 sm:$0xff]  }
  0xa5   : > { %1533 = vmatprep.subr.bf16.mxu0 %v2442_v40  ;;  %1662 = vmatprep.subr.bf16.mxu1 %v2445_v41  ;;  %v2517_v40 = vld [vmem:[#allocation5 + $0x42c] ss:$16 sps:$4 sm:$0xff]  }
  0xa6   : > { %v2936_v41 = vld [vmem:[%s2876_s16 + $0x28] sm:$0xff] }
  0xa8   : > { %1534 = vmatpush1.bf16.msra.mxu0 %v2440_v44  ;;  %1663 = vmatpush1.bf16.msra.mxu1 %v2443_v45  ;;  %v2939_v44 = vld [vmem:[%s2876_s16 + $0x58] sm:$0xff]  ;;  %v2512_v45 = vld [vmem:[#allocation5 + $0x420] ss:$16 sps:$4 sm:$0xff]  }
  0xa9   : > { %1535 = vmatprep.subr.bf16.mxu0 %v2448_v47  ;;  %1664 = vmatprep.subr.bf16.mxu1 %v2451_v48  ;;  %v2515_v47 = vld [vmem:[#allocation5 + $0x428] ss:$16 sps:$4 sm:$0xff]   ;;  %v305_v48 = vpack.c.bf16 %v2939_v44, %v2936_v41 }
  0xac   : > { %1536 = vmatpush1.bf16.msra.mxu0 %v2446_v49  ;;  %1665 = vmatpush1.bf16.msra.mxu1 %v2449_v55  ;;  %v2520_v49 = vld [vmem:[#allocation5 + $0x444] ss:$16 sps:$4 sm:$0xff]   ;;  %v2518_v55 = vld [vmem:[#allocation5 + $0x440] ss:$16 sps:$4 sm:$0xff]  }
  0xad   : > { %1537 = vmatprep.subr.bf16.mxu0 %v2454_v56  ;;  %1666 = vmatprep.subr.bf16.mxu1 %v2457_v53  ;;  %v2521_v56 = vld [vmem:[#allocation5 + $0x448] ss:$16 sps:$4 sm:$0xff]   ;;  %v2529_v53 = vld [vmem:[#allocation5 + $0x46c] ss:$16 sps:$4 sm:$0xff]  }
  0xb0   : > { %1538 = vmatpush1.bf16.msra.mxu0 %v2452_v59  ;;  %1667 = vmatpush1.bf16.msra.mxu1 %v2455_v60  ;;  %v2524_v59 = vld [vmem:[#allocation5 + $0x460] ss:$16 sps:$4 sm:$0xff]   ;;  %v2527_v60 = vld [vmem:[#allocation5 + $0x468] ss:$16 sps:$4 sm:$0xff]  }
  0xb1   : > { %1539 = vmatprep.subr.bf16.mxu0 %v2460_v61  ;;  %1668 = vmatprep.subr.bf16.mxu1 %v2463_v62  ;;  %v2532_v61 = vld [vmem:[#allocation5 + $0x484] ss:$16 sps:$4 sm:$0xff]   ;;  %v2535_v62 = vld [vmem:[#allocation5 + $0x48c] ss:$16 sps:$4 sm:$0xff]  }
  0xb4   : > { %1540 = vmatpush1.bf16.msra.mxu0 %v2458_v63  ;;  %1669 = vmatpush1.bf16.msra.mxu1 %v2461_v0  ;;  %v2530_v63 = vld [vmem:[#allocation5 + $0x480] ss:$16 sps:$4 sm:$0xff]   ;;  %v2533_v0 = vld [vmem:[#allocation5 + $0x488] ss:$16 sps:$4 sm:$0xff]  }
  0xb5   : > { %1541 = vmatprep.subr.bf16.mxu0 %v2466_v1  ;;  %1670 = vmatprep.subr.bf16.mxu1 %v2469_v2  ;;  %v2538_v1 = vld [vmem:[#allocation5 + $0x4a4] ss:$16 sps:$4 sm:$0xff]   ;;  %v2541_v2 = vld [vmem:[#allocation5 + $0x4ac] ss:$16 sps:$4 sm:$0xff]  }
  0xb8   : > { %1542 = vmatpush1.bf16.msra.mxu0 %v2464_v3  ;;  %1671 = vmatpush1.bf16.msra.mxu1 %v2467_v4  ;;  %v2536_v3 = vld [vmem:[#allocation5 + $0x4a0] ss:$16 sps:$4 sm:$0xff]   ;;  %v2539_v4 = vld [vmem:[#allocation5 + $0x4a8] ss:$16 sps:$4 sm:$0xff]  }
  0xb9   : > { %1543 = vmatprep.subr.bf16.mxu0 %v2472_v5  ;;  %1672 = vmatprep.subr.bf16.mxu1 %v2475_v8  ;;  %v2544_v5 = vld [vmem:[#allocation5 + $0x4c4] ss:$16 sps:$4 sm:$0xff]   ;;  %v2547_v8 = vld [vmem:[#allocation5 + $0x4cc] ss:$16 sps:$4 sm:$0xff]  }
  0xbc   : > { %1544 = vmatpush1.bf16.msra.mxu0 %v2470_v9  ;;  %1673 = vmatpush1.bf16.msra.mxu1 %v2473_v10  ;;  %v2542_v9 = vld [vmem:[#allocation5 + $0x4c0] ss:$16 sps:$4 sm:$0xff]   ;;  %v2545_v10 = vld [vmem:[#allocation5 + $0x4c8] ss:$16 sps:$4 sm:$0xff]  }
  0xbd   : > { %1545 = vmatprep.subr.bf16.mxu0 %v2478_v11  ;;  %1674 = vmatprep.subr.bf16.mxu1 %v2481_v12  ;;  %v2550_v11 = vld [vmem:[#allocation5 + $0x4e4] ss:$16 sps:$4 sm:$0xff]   ;;  %v2553_v12 = vld [vmem:[#allocation5 + $0x4ec] ss:$16 sps:$4 sm:$0xff]  }
  0xc0   : > { %1546 = vmatpush1.bf16.msra.mxu0 %v2476_v13  ;;  %1675 = vmatpush1.bf16.msra.mxu1 %v2479_v14  ;;  %v2548_v13 = vld [vmem:[#allocation5 + $0x4e0] ss:$16 sps:$4 sm:$0xff]   ;;  %v2551_v14 = vld [vmem:[#allocation5 + $0x4e8] ss:$16 sps:$4 sm:$0xff]  }
  0xc1   : > { %1547 = vmatprep.subr.bf16.mxu0 %v2484_v15  ;;  %1676 = vmatprep.subr.bf16.mxu1 %v2487_v16  ;;  %v2556_v15 = vld [vmem:[#allocation5 + $0x504] ss:$16 sps:$4 sm:$0xff]   ;;  %v2559_v16 = vld [vmem:[#allocation5 + $0x50c] ss:$16 sps:$4 sm:$0xff]  }
  0xc4   : > { %1548 = vmatpush1.bf16.msra.mxu0 %v2482_v17  ;;  %1677 = vmatpush1.bf16.msra.mxu1 %v2485_v18  ;;  %v2554_v17 = vld [vmem:[#allocation5 + $0x500] ss:$16 sps:$4 sm:$0xff]   ;;  %v2557_v18 = vld [vmem:[#allocation5 + $0x508] ss:$16 sps:$4 sm:$0xff]  }
  0xc5   : > { %1549 = vmatprep.subr.bf16.mxu0 %v2490_v19  ;;  %1678 = vmatprep.subr.bf16.mxu1 %v2493_v20  ;;  %v2562_v19 = vld [vmem:[#allocation5 + $0x524] ss:$16 sps:$4 sm:$0xff]   ;;  %v2565_v20 = vld [vmem:[#allocation5 + $0x52c] ss:$16 sps:$4 sm:$0xff]  }
  0xc8   : > { %1550 = vmatpush1.bf16.msra.mxu0 %v2488_v21  ;;  %1679 = vmatpush1.bf16.msra.mxu1 %v2491_v22  ;;  %v2560_v21 = vld [vmem:[#allocation5 + $0x520] ss:$16 sps:$4 sm:$0xff]   ;;  %v2563_v22 = vld [vmem:[#allocation5 + $0x528] ss:$16 sps:$4 sm:$0xff]  }
  0xc9   : > { %1551 = vmatprep.subr.bf16.mxu0 %v2496_v23  ;;  %1680 = vmatprep.subr.bf16.mxu1 %v2499_v24  ;;  %v2568_v23 = vld [vmem:[#allocation5 + $0x544] ss:$16 sps:$4 sm:$0xff]   ;;  %v2571_v24 = vld [vmem:[#allocation5 + $0x54c] ss:$16 sps:$4 sm:$0xff]  }
  0xcc   : > { %1552 = vmatpush1.bf16.msra.mxu0 %v2494_v25  ;;  %1681 = vmatpush1.bf16.msra.mxu1 %v2497_v26  ;;  %v2566_v25 = vld [vmem:[#allocation5 + $0x540] ss:$16 sps:$4 sm:$0xff]   ;;  %v2569_v26 = vld [vmem:[#allocation5 + $0x548] ss:$16 sps:$4 sm:$0xff]  }
  0xcd   : > { %1553 = vmatprep.subr.bf16.mxu0 %v2502_v27  ;;  %1682 = vmatprep.subr.bf16.mxu1 %v2505_v28  ;;  %v2574_v27 = vld [vmem:[#allocation5 + $0x564] ss:$16 sps:$4 sm:$0xff]   ;;  %v2577_v28 = vld [vmem:[#allocation5 + $0x56c] ss:$16 sps:$4 sm:$0xff]  }
  0xd0   : > { %1554 = vmatpush1.bf16.msra.mxu0 %v2500_v29  ;;  %1683 = vmatpush1.bf16.msra.mxu1 %v2503_v30  ;;  %v2572_v29 = vld [vmem:[#allocation5 + $0x560] ss:$16 sps:$4 sm:$0xff]   ;;  %v2575_v30 = vld [vmem:[#allocation5 + $0x568] ss:$16 sps:$4 sm:$0xff]  }
  0xd1   : > { %1566 = vmatprep.subr.bf16.mxu0 %v2508_v33  ;;  %1695 = vmatprep.subr.bf16.mxu1 %v2511_v34  ;;  %v2580_v33 = vld [vmem:[#allocation5 + $0x584] ss:$16 sps:$4 sm:$0xff]   ;;  %v2583_v34 = vld [vmem:[#allocation5 + $0x58c] ss:$16 sps:$4 sm:$0xff]  }
  0xd3   : > { %1556 = vmatmul.mubr.bf16.vlgmr.msra.gmra.mrb[0].mxu0 %v302_v36  ;;  %1685 = vmatmul.mubr.bf16.vlgmr.msra.gmra.mrb[0].mxu1 %v302_v36  ;;  %v2581_v36 = vld [vmem:[#allocation5 + $0x588] ss:$16 sps:$4 sm:$0xff]  }
  0xd4   : > { %1567 = vmatpush1.bf16.msra.mxu0 %v2506_v35  ;;  %1696 = vmatpush1.bf16.msra.mxu1 %v2509_v37  ;;  %v2578_v35 = vld [vmem:[#allocation5 + $0x580] ss:$16 sps:$4 sm:$0xff]   ;;  %v2586_v37 = vld [vmem:[#allocation5 + $0x5a4] ss:$16 sps:$4 sm:$0xff]  }
  0xd5   : > { %1568 = vmatprep.subr.bf16.mxu0 %v2514_v39  ;;  %1697 = vmatprep.subr.bf16.mxu1 %v2517_v40  ;;  %v2589_v39 = vld [vmem:[#allocation5 + $0x5ac] ss:$16 sps:$4 sm:$0xff]   ;;  %v2584_v40 = vld [vmem:[#allocation5 + $0x5a0] ss:$16 sps:$4 sm:$0xff]  }
  0xd6   : > { %1598 = vmatprep.mubr.bf16.mxu0 %v305_v48  ;;  %1727 = vmatprep.mubr.bf16.mxu1 %v305_v48  ;;  %v2595_v48 = vld [vmem:[#allocation5 + $0x5cc] ss:$16 sps:$4 sm:$0xff]  }
  0xd8   : > { %1569 = vmatpush1.bf16.msra.mxu0 %v2512_v45  ;;  %1698 = vmatpush1.bf16.msra.mxu1 %v2515_v47  ;;  %v2587_v45 = vld [vmem:[#allocation5 + $0x5a8] ss:$16 sps:$4 sm:$0xff]   ;;  %v2592_v47 = vld [vmem:[#allocation5 + $0x5c4] ss:$16 sps:$4 sm:$0xff]  }
  0xd9   : > { %1570 = vmatprep.subr.bf16.mxu0 %v2520_v49  ;;  %1699 = vmatprep.subr.bf16.mxu1 %v2523_v54  ;;  %v2590_v49 = vld [vmem:[#allocation5 + $0x5c0] ss:$16 sps:$4 sm:$0xff]   ;;  %v2593_v54 = vld [vmem:[#allocation5 + $0x5c8] ss:$16 sps:$4 sm:$0xff]  }
  0xdc   : > { %1571 = vmatpush1.bf16.msra.mxu0 %v2518_v55  ;;  %1700 = vmatpush1.bf16.msra.mxu1 %v2521_v56  ;;  %v2598_v55 = vld [vmem:[#allocation5 + $0x5e4] ss:$16 sps:$4 sm:$0xff]   ;;  %v2601_v56 = vld [vmem:[#allocation5 + $0x5ec] ss:$16 sps:$4 sm:$0xff]  }
  0xdd   : > { %1572 = vmatprep.subr.bf16.mxu0 %v2526_v57  ;;  %1701 = vmatprep.subr.bf16.mxu1 %v2529_v53  ;;  %v2596_v57 = vld [vmem:[#allocation5 + $0x5e0] ss:$16 sps:$4 sm:$0xff]   ;;  %v2599_v53 = vld [vmem:[#allocation5 + $0x5e8] ss:$16 sps:$4 sm:$0xff]  }
  0xe0   : > { %1573 = vmatpush1.bf16.msra.mxu0 %v2524_v59  ;;  %1702 = vmatpush1.bf16.msra.mxu1 %v2527_v60  ;;  %v2944_v59 = vld [vmem:[%s2876_s16 + $0x20] sm:$0xff]  ;;  %v2947_v60 = vld [vmem:[%s2876_s16 + $0x50] sm:$0xff] }
  0xe1   : > { %1574 = vmatprep.subr.bf16.mxu0 %v2532_v61  ;;  %1703 = vmatprep.subr.bf16.mxu1 %v2535_v62  ;;  %v304_v61 = vpack.c.bf16 %v2947_v60, %v2944_v59  ;;  %v2952_v62 = vsub.s32 2, %v2887_v43 }
  0xe4   : > { %1575 = vmatpush1.bf16.msra.mxu0 %v2530_v63  ;;  %1704 = vmatpush1.bf16.msra.mxu1 %v2533_v0  ;;  %v498_v63 = vld [vmem:[%s3025_s2] sm:$0xf] }
  0xe5   : > { %1576 = vmatprep.subr.bf16.mxu0 %v2538_v1  ;;  %1705 = vmatprep.subr.bf16.mxu1 %v2541_v2  ;;  %v503_v0 = vrot.slane %v498_v63, %v2894_v51  ;;  %v511_v1 = vrot.slane %v498_v63, %v2952_v62 }
  0xe8   : > { %1577 = vmatpush1.bf16.msra.mxu0 %v2536_v3  ;;  %1706 = vmatpush1.bf16.msra.mxu1 %v2539_v4  ;;  %v507_v4 = vrot.slane %v498_v63, %v2891_v50 }
  0xe9   : > { %1578 = vmatprep.subr.bf16.mxu0 %v2544_v5  ;;  %1707 = vmatprep.subr.bf16.mxu1 %v2547_v8  ;;  %v515_v5 = vrot.slane %v498_v63, %v2913_v42 }
  0xec   : > { %1579 = vmatpush1.bf16.msra.mxu0 %v2542_v9  ;;  %1708 = vmatpush1.bf16.msra.mxu1 %v2545_v10 }
  0xed   : > { %1580 = vmatprep.subr.bf16.mxu0 %v2550_v11  ;;  %1709 = vmatprep.subr.bf16.mxu1 %v2553_v12 }
  0xf0   : > { %1581 = vmatpush1.bf16.msra.mxu0 %v2548_v13  ;;  %1710 = vmatpush1.bf16.msra.mxu1 %v2551_v14 }
  0xf1   : > { %1582 = vmatprep.subr.bf16.mxu0 %v2556_v15  ;;  %1711 = vmatprep.subr.bf16.mxu1 %v2559_v16 }
  0xf4   : > { %1583 = vmatpush1.bf16.msra.mxu0 %v2554_v17  ;;  %1712 = vmatpush1.bf16.msra.mxu1 %v2557_v18 }
  0xf5   : > { %1584 = vmatprep.subr.bf16.mxu0 %v2562_v19  ;;  %1713 = vmatprep.subr.bf16.mxu1 %v2565_v20 }
  0xf8   : > { %1585 = vmatpush1.bf16.msra.mxu0 %v2560_v21  ;;  %1714 = vmatpush1.bf16.msra.mxu1 %v2563_v22 }
  0xf9   : > { %1586 = vmatprep.subr.bf16.mxu0 %v2568_v23  ;;  %1715 = vmatprep.subr.bf16.mxu1 %v2571_v24 }
  0xfc   : > { %1587 = vmatpush1.bf16.msra.mxu0 %v2566_v25  ;;  %1716 = vmatpush1.bf16.msra.mxu1 %v2569_v26  ;;  %v1746_v26 = vld [vmem:[%s3026_s3] sm:$0xf] }
  0xfd   : > { %1588 = vmatprep.subr.bf16.mxu0 %v2574_v27  ;;  %1717 = vmatprep.subr.bf16.mxu1 %v2577_v28  ;;  %v1759_v27 = vrot.slane %v1746_v26, %v2894_v51 }
 0x100   : > { %1589 = vmatpush1.bf16.msra.mxu0 %v2572_v29  ;;  %1718 = vmatpush1.bf16.msra.mxu1 %v2575_v30 }
 0x101   : > { %1590 = vmatprep.subr.bf16.mxu0 %v2580_v33  ;;  %1719 = vmatprep.subr.bf16.mxu1 %v2583_v34  ;;  %v1763_v33 = vrot.slane %v1746_v26, %v2891_v50 }
 0x104   : > { %1591 = vmatpush1.bf16.msra.mxu0 %v2578_v35  ;;  %1720 = vmatpush1.bf16.msra.mxu1 %v2581_v36 }
 0x105   : > { %1592 = vmatprep.subr.bf16.mxu0 %v2586_v37  ;;  %1721 = vmatprep.subr.bf16.mxu1 %v2589_v39  ;;  %v1767_v37 = vrot.slane %v1746_v26, %v2952_v62 }
 0x108   : > { %1593 = vmatpush1.bf16.msra.mxu0 %v2584_v40  ;;  %1722 = vmatpush1.bf16.msra.mxu1 %v2587_v45 }
 0x109   : > { %1594 = vmatprep.subr.bf16.mxu0 %v2592_v47  ;;  %1723 = vmatprep.subr.bf16.mxu1 %v2595_v48 }
 0x10c   : > { %1595 = vmatpush1.bf16.msra.mxu0 %v2590_v49  ;;  %1724 = vmatpush1.bf16.msra.mxu1 %v2593_v54  ;;  %v1771_v54 = vrot.slane %v1746_v26, %v2913_v42  ;;  %v2616_v26 = vld [vmem:[%s3027_s4] sm:$0x3f] }
 0x10d   : > { %1596 = vmatprep.subr.bf16.mxu0 %v2598_v55  ;;  %1725 = vmatprep.subr.bf16.mxu1 %v2601_v56 }
 0x110   : > { %1597 = vmatpush1.bf16.msra.mxu0 %v2596_v57  ;;  %1726 = vmatpush1.bf16.msra.mxu1 %v2599_v53 }
 0x113   : > { %1599 = vmatmul.mubr.bf16.vlgmr.msra.gmra.mrb[0].mxu0 %v304_v61  ;;  %1728 = vmatmul.mubr.bf16.vlgmr.msra.gmra.mrb[0].mxu1 %v304_v61 }
 0x1e6   : > { %v1600_v2 = vpop.f32.mrb[0].mxu0  ;;  %v1729_v3 = vpop.f32.mrb[0].mxu1 }
 0x1e7   : > { %v1602_v8 = vpop.f32.mrb[1].mxu0  ;;  %v1731_v9 = vpop.f32.mrb[1].mxu1  ;;  %v2230_v12 = vadd.f32 %v1600_v2, %v503_v0  ;;  %v2234_v13 = vadd.f32 %v1729_v3, %v511_v1 }
 0x1e8   : > { %v1604_v10 = vpop.f32.mrb[2].mxu0  ;;  %v1733_v11 = vpop.f32.mrb[2].mxu1  ;;  %v2231_v18 = vadd.f32 %v1602_v8, %v507_v4  ;;  %v2235_v19 = vadd.f32 %v1731_v9, %v515_v5 }
 0x1e9   : > { %v2232_v14 = vadd.f32 %v1604_v10, %v503_v0  ;;  %v2236_v15 = vadd.f32 %v1733_v11, %v511_v1  ;;  %v1606_v16 = vpop.f32.mrb[3].mxu0  ;;  %v1735_v17 = vpop.f32.mrb[3].mxu1  ;;  %v1855_v10 = vand.u32 127, %v500_v38 }
 0x1ea   : > { %v2233_v20 = vadd.f32 %v1606_v16, %v507_v4  ;;  %v2237_v21 = vadd.f32 %v1735_v17, %v515_v5  ;;  %v2721_v17 = vmov 0  }
 0x1eb   : > { %v1738_v22 = vpack.c.bf16 %v2232_v14, %v2230_v12  ;;  %v1740_v23 = vpack.c.bf16 %v2236_v15, %v2234_v13  ;;  %v2970_v42 = vsub.s32 %v1855_v10, %v2887_v43  ;;  %2313 = vset.pattern.permute.xlu0 %v2721_v17  ;;  %2312 = vset.pattern.permute.xlu1 %v2721_v17 }
 0x1ec   : > { %v1739_v24 = vpack.c.bf16 %v2233_v20, %v2231_v18  ;;  %v1741_v25 = vpack.c.bf16 %v2237_v21, %v2235_v19 }
 0x1ed   : > { %2602 = vtanh.bf16 %v1738_v22 }
 0x1ee   : > { %2604 = vtanh.bf16 %v1740_v23 }
 0x1ef   : > { %2606 = vtanh.bf16 %v1739_v24 }
 0x1f0   : > { %2608 = vtanh.bf16 %v1741_v25 }
 0x1f8   : > { %v2603_v28 = vpop.eup %2602 }
 0x1f9   : > { %v2605_v29 = vpop.eup %2604  ;;  %v1747_v30 = vunpack.c.l.bf16 %v2603_v28  ;;  %v1751_v34 = vunpack.c.h.bf16 %v2603_v28  ;;  %v1814_v28 = vsub.s32 4, %v2887_v43 }
 0x1fa   : > { %v2607_v35 = vpop.eup %2606  ;;  %v1749_v36 = vunpack.c.l.bf16 %v2605_v29  ;;  %v1753_v39 = vunpack.c.h.bf16 %v2605_v29  ;;  %v1818_v29 = vsub.s32 5, %v2887_v43 }
 0x1fb   : > { %v2609_v40 = vpop.eup %2608  ;;  %v1748_v45 = vunpack.c.l.bf16 %v2607_v35  ;;  %v1776_v47 = vmul.f32 %v1759_v27, %v1747_v30  ;;  %v1752_v48 = vunpack.c.h.bf16 %v2607_v35  ;;  %v1780_v49 = vmul.f32 %v1759_v27, %v1751_v34 }
 0x1fc   : > { %v1750_v55 = vunpack.c.l.bf16 %v2609_v40  ;;  %v1754_v57 = vunpack.c.h.bf16 %v2609_v40  ;;  %v1778_v61 = vmul.f32 %v1767_v37, %v1749_v36  ;;  %v1782_v0 = vmul.f32 %v1767_v37, %v1753_v39 }
 0x1fd   : > { %v1777_v56 = vmul.f32 %v1763_v33, %v1748_v45  ;;  %v1781_v53 = vmul.f32 %v1763_v33, %v1752_v48  ;;  %v1807_v27 = vrot.slane %v2616_v26, %v2952_v62  ;;  %v1829_v30 = vmul.f32 %v2917_v46, %v2920_v52 }
 0x1fe   : > { %v1779_v2 = vmul.f32 %v1771_v54, %v1750_v55  ;;  %v1783_v4 = vmul.f32 %v1771_v54, %v1754_v57  ;;  %v1815_v33 = vrot.slane %v2616_v26, %v1814_v28  ;;  %v1819_v36 = vrot.slane %v2616_v26, %v1818_v29 }
 0x1ff   : > { %v1784_v63 = vadd.f32 %v1777_v56, %v1776_v47  ;;  %v1789_v1 = vadd.f32 %v1781_v53, %v1780_v49  ;;  %v1828_v34 = vmul.f32 %v1807_v27, %v2928_v31  ;;  %v1834_v35 = vmul.f32 %v1807_v27, %v2931_v32 }
 0x200   : > { %v1836_v39 = vmul.f32 %v1815_v33, %v2947_v60  ;;  %v1837_v45 = vmul.f32 %v1819_v36, %v2939_v44  ;;  %v1830_v46 = vmul.f32 %v1815_v33, %v2944_v59  ;;  %v1831_v52 = vmul.f32 %v1819_v36, %v2936_v41 }
 0x201   : > { %v1785_v3 = vadd.f32 %v1784_v63, %v1778_v61  ;;  %v1790_v5 = vadd.f32 %v1789_v1, %v1782_v0  ;;  %v1839_v37 = vadd.f32 %v2908_v6, %v1828_v34  ;;  %v1846_v40 = vadd.f32 %v2910_v7, %v1834_v35 }
 0x203   : > { %v1786_v8 = vadd.f32 %v1785_v3, %v1779_v2  ;;  %v1791_v9 = vadd.f32 %v1790_v5, %v1783_v4  ;;  %v1840_v62 = vadd.f32 %v1839_v37, %v1829_v30  ;;  %v1847_v43 = vadd.f32 %v1846_v40, %v2925_v58 }
 0x204   : > { %v1947_v5 = vstv %s1946_s19 }
 0x205   : > { %1787 = vadd.xlane.f32.xlu0 %v1786_v8  ;;  %v1848_v47 = vadd.f32 %v1847_v43, %v1836_v39  ;;  %v1841_v31 = vadd.f32 %v1840_v62, %v1830_v46 }
 0x207   : > { %v1849_v48 = vadd.f32 %v1848_v47, %v1837_v45  ;;  %v1842_v32 = vadd.f32 %v1841_v31, %v1831_v52 }
 0x209   : > { %1792 = vadd.xlane.f32.xlu0 %v1791_v9 }
 0x292   : > { %v1788_v11 = vpop.xlane.xlu0 %1787 }
 0x293   : > { %v1859_v13 = vrot.slane %v1788_v11, %v2970_v42 }
 0x296   : > { %v1793_v12 = vpop.xlane.xlu0 %1792 }
 0x297   : > { %v1863_v14 = vrot.slane %v1793_v12, %v2970_v42 }
 0x299   : > { %v1865_v15 = vsel %vm1864_vm0, %v1863_v14, %v1859_v13 }
 0x29a   : > { %v1868_v16 = vsel %vm1867_vm1, %v1865_v15, -inf }
 0x29b   : > { %1869 = vmax.xlane.f32.xlu1 %v1868_v16 }
 0x328   : > { %v1870_v38 = vpop.xlane.xlu1 %1869 }
 0x329   : > { %v1875_v18 = vrot.slane %v1870_v38, %v2894_v51  ;;  %v1879_v19 = vrot.slane %v1870_v38, %v2891_v50 }
 0x32b   : > { %v1882_v20 = vsub.f32 %v1788_v11, %v1875_v18  ;;  %v1883_v21 = vsub.f32 %v1793_v12, %v1879_v19 }
 0x32d   : > { %v1884_v22 = vmul.f32 1.442695, %v1882_v20  ;;  %v1886_v23 = vmul.f32 1.442695, %v1883_v21 }
 0x32f   : > { %2610 = vpow2.f32 %v1884_v22 }
 0x330   : > { %2612 = vpow2.f32 %v1886_v23 }
 0x339   : > { %v2611_v24 = vpop.eup %2610 }
 0x33a   : > { %v2613_v25 = vpop.eup %2612  ;;  %1891 = vperm.xlu1 %2312, %v2611_v24  }
 0x33b   : > { %1894 = vperm.xlu0 %2313, %v2613_v25  }
 0x35a   : > { %1843 = vadd.xlane.f32.xlu0 %v1842_v32 }
 0x3b9   : > { %v1892_v49 = vpop.permute.xlu1 %1891 }
 0x3ba   : > { %v1895_v6 = vpop.permute.xlu0 %1894  ;;  %v1899_v60 = vrot.slane %v1892_v49, %v2970_v42 }
 0x3bb   : > { %v1903_v7 = vrot.slane %v1895_v6, %v2970_v42 }
 0x3bd   : > { %v1904_v54 = vsel %vm1864_vm0, %v1903_v7, %v1899_v60 }
 0x3be   : > { %v1906_v44 = vsel %vm1867_vm1, %v1904_v54, 0.0 }
 0x3bf   : > { %1907 = vadd.xlane.f32.xlu1 %v1906_v44 }
 0x3c3   : > { %1850 = vadd.xlane.f32.xlu1 %v1849_v48 }
 0x3e7   : > { %v1844_v56 = vpop.xlane.xlu0 %1843 }
 0x44c   : > { %v1908_v58 = vpop.xlane.xlu1 %1907 }
 0x44d   : > { %2614 = vrcp.f32 %v1908_v58 }
 0x450   : > { %v1851_v63 = vpop.xlane.xlu1 %1850 }
 0x457   : > { %v2615_v59 = vpop.eup %2614 }
 0x458   : > { %v1914_v41 = vrot.slane %v2615_v59, %v2894_v51  ;;  %v1918_v55 = vrot.slane %v2615_v59, %v2891_v50 }
 0x45a   : > { %v1921_v57 = vmul.f32 %v2611_v24, %v1914_v41  ;;  %v1922_v61 = vmul.f32 %v2613_v25, %v1918_v55 }
 0x45c   : > { %v1923_v53 = vmul.f32 %v1921_v57, %v1844_v56  ;;  %v1924_v0 = vmul.f32 %v1922_v61, %v1851_v63 }
 0x45e   : > { %1928 = vperm.xlu1 %2312, %v1923_v53  }
 0x462   : > { %1931 = vperm.xlu1 %2312, %v1924_v0  }
 0x4dd   : > { %v1929_v1 = vpop.permute.xlu1 %1928 }
 0x4de   : > { %v1936_v3 = vrot.slane %v1929_v1, %v2970_v42 }
 0x4e1   : > { %v1932_v2 = vpop.permute.xlu1 %1931 }
 0x4e2   : > { %v1940_v4 = vrot.slane %v1932_v2, %v2970_v42 }
 0x4e4   : > { %v1941_v51 = vsel %vm1864_vm0, %v1940_v4, %v1936_v3 }
 0x4e5   : > { %v1943_v50 = vsel %vm1867_vm1, %v1941_v51, 0.0 }
 0x4e6   : > { %1944 = vadd.xlane.f32.xlu1 %v1943_v50 }
 0x573   : > { %v1945_v8 = vpop.xlane.xlu1 %1944 }
 0x574   : > { %v1948_v9 = vadd.f32 %v1947_v5, %v1945_v8 }
 0x576   : > { %1950 = vst.msk [vmem:[%s287_s29] sm:$0x3] %vm1949_vm2, %v1948_v9 }
 0x577 PF: > { %s3041_s11 = smov %s2830_s23  ;;  %p18_p8 = scmp.ge.s32.totalorder %s2804_s8, 4  }
 0x578   : > { %s3042_s23 = smov %s2705_s24  ;;  %s3043_s24 = smov %s2709_s25 }
 0x579   : > { %s3044_s25 = smov %s3041_s11  ;;  %s3045_s26 = smov %s2804_s8 }
 0x57a   :  { %20 = sbr.rel (!%p18_p8) target bundleno = 6 (0x6), region = 88 }
 0x581   :  { %1970 = vsyncpa [#allocation4], 1 }
 0x582   :  { %1972 = vsyncpa [#allocation4 + $0x1], 1 }
 0x583   :  { %1973 = vsyncpa [#allocation6], 1 }

</bundles_post_ra>
